<compile_context>
chip_gen: v6e
topology: v6e:2x2x1
jax: 0.10.0
libtpu: 0.0.40
codegen_flags: <defaults>
</compile_context>

<pallas_src>
import functools

import jax
import jax.numpy as jnp
from jax import lax
from jax.experimental import pallas as pl
from jax.experimental.pallas import tpu as pltpu


def _round_up(x, m):
    return (x + m - 1) // m * m


def _patch_embed_kernel(x_ref, w_ref, scale_ref, bias_ref, o_ref):
    # x_ref:     (1, K, TN)  bf16  patchified input tile (patches on the lane axis)
    # w_ref:     (E, K)      bf16  flattened conv weight (resident across the grid)
    # scale_ref: (E, 1)      f32   eval-mode BatchNorm scale (resident)
    # bias_ref:  (E, 1)      f32   eval-mode BatchNorm bias  (resident)
    # o_ref:     (1, E, TN)  bf16  output tile, already in NCHW-flattened layout
    acc = jnp.dot(w_ref[...], x_ref[0], preferred_element_type=jnp.float32)  # (E, TN)
    o_ref[0] = (acc * scale_ref[...] + bias_ref[...]).astype(o_ref.dtype)


@functools.partial(jax.jit, static_argnames=("patch_size", "patch_stride", "tn"))
def patch_embed_forward(x, conv_w, bn_gamma, bn_beta, bn_mean, bn_var,
                        patch_size, patch_stride, eps=1e-5, tn=2048):
    """x: [B, C, H, W] (NCHW). conv_w: [E, C, p, p] (PyTorch OIHW). Returns bf16 NCHW."""
    assert patch_size == patch_stride, "non-overlapping patch embed assumed"
    B, C, H, W = x.shape
    E = conv_w.shape[0]
    p = patch_size
    assert H % p == 0 and W % p == 0, "spatial dims must be divisible by patch size"
    Hp, Wp = H // p, W // p
    N = Hp * Wp            # patches per image (output lane axis)
    K = C * p * p          # contraction (flattened patch) -- NOT padded in HBM

    # --- glue: patchify to [B, K, N]; K order = (c, ph, pw) matches OIHW weight ----
    # TODO(synk): this transpose is still one extra XLA pass over the input; an NHWC
    # input upstream (or an in-kernel patchify) would remove that HBM round trip.
    xp = x.reshape(B, C, Hp, p, Wp, p).transpose(0, 1, 3, 5, 2, 4)
    xp = xp.reshape(B, K, N).astype(jnp.bfloat16)

    # --- weight + eval-mode BatchNorm epilogue (f32 scale/bias, not folded) --------
    w2d = conv_w.reshape(E, K).astype(jnp.bfloat16)                    # (E, K)
    scale = (bn_gamma / jnp.sqrt(bn_var + eps)).astype(jnp.float32)    # (E,)
    bias = (bn_beta - bn_mean * scale).astype(jnp.float32)             # (E,)
    scale = scale.reshape(E, 1)
    bias = bias.reshape(E, 1)

    # --- patch-axis tiling ----------------------------------------------------------
    if N <= tn:
        if B == 1 and N >= 256:
            # keep at least 2 grid steps so both v7x TensorCores get work
            tn_eff = _round_up(-(-N // 2), 128)
        else:
            tn_eff = N          # full-dim block: no lane padding written to HBM
    else:
        tn_eff = tn             # multiple of 512 -> lane-dense, unmasked stores
    grid = (B, pl.cdiv(N, tn_eff))

    out3 = pl.pallas_call(
        _patch_embed_kernel,
        out_shape=jax.ShapeDtypeStruct((B, E, N), jnp.bfloat16),
        grid_spec=pltpu.PrefetchScalarGridSpec(
            num_scalar_prefetch=0,
            grid=grid,
            in_specs=[
                pl.BlockSpec((1, K, tn_eff), lambda b, j: (b, 0, j)),   # X tile (streamed)
                pl.BlockSpec((E, K), lambda b, j: (0, 0)),              # W (resident)
                pl.BlockSpec((E, 1), lambda b, j: (0, 0)),              # BN scale
                pl.BlockSpec((E, 1), lambda b, j: (0, 0)),              # BN bias
            ],
            out_specs=pl.BlockSpec((1, E, tn_eff), lambda b, j: (b, 0, j)),
        ),
        compiler_params=pltpu.CompilerParams(
            # Pure data-parallel grid (no reduction axis) -> both axes parallel;
            # shards work across the two TensorCores on v7x, neutral on v5e/v6e.
            dimension_semantics=("parallel", "parallel"),
            # Worst FasterNet merge stage at tn=2048 is ~20 MiB double-buffered;
            # 32 MiB is ample and well under the v7x 64 MiB physical ceiling.
            vmem_limit_bytes=32 * 1024 * 1024,
            # Let XLA try to fuse the patchify transpose / bf16 cast into the X feed.
            allow_input_fusion=[True, False, False, False],
        ),
    )(xp, w2d, scale, bias)

    # NCHW: [B, E, N] -> [B, E, Hp, Wp] is a free row-major reshape (no transpose).
    return out3.reshape(B, E, Hp, Wp)


def _reference(x, conv_w, bn_gamma, bn_beta, bn_mean, bn_var,
               patch_size, patch_stride, eps=1e-5):
    """Pure-JAX f32 reference: conv (NCHW) + BatchNorm2d eval."""
    y = lax.conv_general_dilated(
        x.astype(jnp.float32), conv_w.astype(jnp.float32),
        window_strides=(patch_stride, patch_stride), padding="VALID",
        dimension_numbers=("NCHW", "OIHW", "NCHW"))
    inv = 1.0 / jnp.sqrt(bn_var + eps)
    scale = (bn_gamma * inv)[None, :, None, None]
    bias = (bn_beta - bn_mean * bn_gamma * inv)[None, :, None, None]
    return y * scale + bias


if __name__ == "__main__":
    # Small deterministic config: B=2, in_chans=4, H=W=16, patch 4x4 stride 4,
    # embed_dim=32  ->  output [2, 32, 4, 4].
    B, C, H, W = 2, 4, 16, 16
    patch_size = patch_stride = 4
    E = 32

    key = jax.random.PRNGKey(0)
    kx, kw, kg, kb, km, kv = jax.random.split(key, 6)

    x = jax.random.normal(kx, (B, C, H, W), dtype=jnp.float32)
    conv_w = jax.random.normal(kw, (E, C, patch_size, patch_size),
                               dtype=jnp.float32) * 0.1
    bn_gamma = 1.0 + 0.1 * jax.random.normal(kg, (E,), dtype=jnp.float32)
    bn_beta = 0.1 * jax.random.normal(kb, (E,), dtype=jnp.float32)
    bn_mean = 0.1 * jax.random.normal(km, (E,), dtype=jnp.float32)
    bn_var = jnp.abs(1.0 + 0.1 * jax.random.normal(kv, (E,), dtype=jnp.float32))

    out = patch_embed_forward(x, conv_w, bn_gamma, bn_beta, bn_mean, bn_var,
                              patch_size, patch_stride)
    out = jax.block_until_ready(out)

    ref = _reference(x, conv_w, bn_gamma, bn_beta, bn_mean, bn_var,
                     patch_size, patch_stride)
    assert out.shape == (B, E, H // patch_size, W // patch_size), out.shape
    # bf16 inputs + bf16 output (f32 accumulation) -> ~1e-2 relative tolerance.
    err = jnp.max(jnp.abs(out.astype(jnp.float32) - ref))
    assert jnp.allclose(out.astype(jnp.float32), ref, atol=2e-2, rtol=2e-2), float(err)

    print("KERNEL_OK")
</pallas_src>

<mosaic_0001>
module attributes {stable_mosaic.version = 11 : i64} {
  func.func @_patch_embed_kernel(%arg0: i32, %arg1: i32, %arg2: memref<1x64x16xbf16, #tpu.memory_space<vmem>>, %arg3: memref<32x64xbf16, #tpu.memory_space<vmem>>, %arg4: memref<32x1xf32, #tpu.memory_space<vmem>>, %arg5: memref<32x1xf32, #tpu.memory_space<vmem>>, %arg6: memref<1x32x16xbf16, #tpu.memory_space<vmem>>) attributes {dimension_semantics = [#tpu.dimension_semantics<parallel>, #tpu.dimension_semantics<parallel>], iteration_bounds = array<i64: 2, 1>, scalar_prefetch = 0 : i64, scratch_operands = 0 : i64, tpu.core_type = #tpu.core_type<tc>, window_params = [{transform_indices = @transform_0, window_bounds = array<i64: 1, 64, 16>}, {pipeline_mode = #tpu.pipeline_mode<synchronous>, transform_indices = @transform_1, window_bounds = array<i64: 32, 64>}, {pipeline_mode = #tpu.pipeline_mode<synchronous>, transform_indices = @transform_2, window_bounds = array<i64: 32, 1>}, {pipeline_mode = #tpu.pipeline_mode<synchronous>, transform_indices = @transform_3, window_bounds = array<i64: 32, 1>}, {transform_indices = @transform_4, window_bounds = array<i64: 1, 32, 16>}]} {
    %c0 = arith.constant 0 : index
    %c0_0 = arith.constant 0 : index
    %0 = vector.load %arg3[%c0, %c0_0] : memref<32x64xbf16, #tpu.memory_space<vmem>>, vector<32x64xbf16>
    %c0_1 = arith.constant 0 : index
    %c0_2 = arith.constant 0 : index
    %c0_3 = arith.constant 0 : index
    %1 = vector.load %arg2[%c0_1, %c0_2, %c0_3] : memref<1x64x16xbf16, #tpu.memory_space<vmem>>, vector<1x64x16xbf16>
    %2 = vector.shape_cast %1 : vector<1x64x16xbf16> to vector<64x16xbf16>
    %cst = arith.constant dense<0.000000e+00> : vector<32x16xf32>
    %3 = tpu.matmul %0, %2, %cst {dimension_numbers = #tpu.dot_dimension_numbers<[1], [0], [0], [1], [0, 0, 1, 1], [], []>} : vector<32x64xbf16>, vector<64x16xbf16>, vector<32x16xf32> -> vector<32x16xf32>
    %c0_4 = arith.constant 0 : index
    %c0_5 = arith.constant 0 : index
    %4 = vector.load %arg4[%c0_4, %c0_5] : memref<32x1xf32, #tpu.memory_space<vmem>>, vector<32x1xf32>
    %5 = vector.broadcast %4 : vector<32x1xf32> to vector<32x16xf32>
    %6 = arith.mulf %3, %5 : vector<32x16xf32>
    %c0_6 = arith.constant 0 : index
    %c0_7 = arith.constant 0 : index
    %7 = vector.load %arg5[%c0_6, %c0_7] : memref<32x1xf32, #tpu.memory_space<vmem>>, vector<32x1xf32>
    %8 = vector.broadcast %7 : vector<32x1xf32> to vector<32x16xf32>
    %9 = arith.addf %6, %8 : vector<32x16xf32>
    %10 = arith.truncf %9 : vector<32x16xf32> to vector<32x16xbf16>
    %c0_8 = arith.constant 0 : index
    %c0_9 = arith.constant 0 : index
    %c0_10 = arith.constant 0 : index
    %11 = vector.load %arg6[%c0_8, %c0_9, %c0_10] : memref<1x32x16xbf16, #tpu.memory_space<vmem>>, vector<1x32x16xbf16>
    %12 = vector.shape_cast %11 : vector<1x32x16xbf16> to vector<32x16xbf16>
    %13 = vector.shape_cast %10 : vector<32x16xbf16> to vector<1x32x16xbf16>
    tpu.vector_store %arg6[%c0_8, %c0_9, %c0_10], %13 {strides = array<i32>} : memref<1x32x16xbf16, #tpu.memory_space<vmem>>, vector<1x32x16xbf16>,
    return
  }
  func.func @transform_0(%arg0: i32, %arg1: i32) -> (i32, i32, i32) {
    %c0_i32 = arith.constant 0 : i32
    %c0_i32_0 = arith.constant 0 : i32
    return %arg0, %c0_i32, %arg1 : i32, i32, i32
  }
  func.func @transform_1(%arg0: i32, %arg1: i32) -> (i32, i32) {
    %c0_i32 = arith.constant 0 : i32
    %c0_i32_0 = arith.constant 0 : i32
    %c0_i32_1 = arith.constant 0 : i32
    return %c0_i32, %c0_i32_0 : i32, i32
  }
  func.func @transform_2(%arg0: i32, %arg1: i32) -> (i32, i32) {
    %c0_i32 = arith.constant 0 : i32
    %c0_i32_0 = arith.constant 0 : i32
    %c0_i32_1 = arith.constant 0 : i32
    return %c0_i32, %c0_i32_0 : i32, i32
  }
  func.func @transform_3(%arg0: i32, %arg1: i32) -> (i32, i32) {
    %c0_i32 = arith.constant 0 : i32
    %c0_i32_0 = arith.constant 0 : i32
    %c0_i32_1 = arith.constant 0 : i32
    return %c0_i32, %c0_i32_0 : i32, i32
  }
  func.func @transform_4(%arg0: i32, %arg1: i32) -> (i32, i32, i32) {
    %c0_i32 = arith.constant 0 : i32
    %c0_i32_0 = arith.constant 0 : i32
    return %arg0, %c0_i32, %arg1 : i32, i32, i32
  }
}

</mosaic_0001>

<bundles_post_ra>
// kernel: patch_embed_forward.1
= control target key start
LH: loop header
LB: loop body
LE: loop exit
PB: predicated region body
PF: predicated region fallthrough
CT: control target
= control target key end

     0   :  { %s622_s15 = smov 0   ;;  %s624_s16 = smov 0   ;;  %s695_s0 = inlined_call_operand.vmem [shape: bf16[2,64,16], index: 0, kind: input, shape index: {}]   ;;  %s696_s1 = inlined_call_operand.vmem [shape: bf16[32,64], index: 1, kind: input, shape index: {}]   ;;  %s697_s2 = inlined_call_operand.vmem [shape: f32[32,1], index: 2, kind: input, shape index: {}]   ;;  %s698_s3 = inlined_call_operand.vmem [shape: f32[32,1], index: 3, kind: input, shape index: {}]   ;;  %s699_s4 = inlined_call_operand.vmem [shape: bf16[2,32,16], index: 4, kind: output, shape index: {}]  }
   0x1   :  { %s626_s17 = smov 0  }
   0x2 LB: > { %s26_s18 = sadd.s32 1, %s590_s16  ;;  %p496_p0 = scmp.ge.s32.totalorder %s594_s17, 1  ;;  %s594_s17 = sphi %s626_s17, %s14_s17   ;;  %s590_s16 = sphi %s624_s16, %s701_s16   ;;  %s586_s15 = sphi %s622_s15, %s700_s15  }
   0x3   : > { %p28_p1 = scmp.ge.s32.totalorder %s26_s18, 2  ;;  %p181_p2 = scmp.lt.s32.totalorder %s594_s17, 3 }
   0x5   : > { %s703_s18 = smov (%p28_p1, %s26_s18), 0  ;;  %p182_p3 = pnand %p496_p0, %p181_p2 }
   0x6   : > { %p213_p4 = scmp.lt.s32.totalorder (!%p182_p3), %s586_s15, 1 }
   0x7   : > { %185 = sbr.rel (%p182_p3) target bundleno = 238 (0xee), region = 36 }
   0xc   : > { %v570_v0 = vld [vmem:[%s696_s1] sm:$0xff]   ;;  %vm276_vm0 = vcmask 523264   ;;  %s705_s15 = smov (!%p213_p4, %s586_s15), 1  ;;  %v334_v1 = vld [vmem:[%s697_s2 + $0x10] sm:$0xff]  ;;  %v596_v3 = vmov 0   ;;  %v335_v4 = vld [vmem:[%s697_s2 + $0x18] sm:$0xff] }
   0xd   : > { %535 = vmatprep.mubr.msk.bf16.mxu0 %vm276_vm0, %v570_v0  ;;  %v332_v2 = vld [vmem:[%s697_s2] sm:$0xff]  ;;  %565 = vset.pattern.permute.xlu1 %v596_v3  ;;  %s515_s25 = sshll.u32 %s705_s15, 5  ;;  %v333_v5 = vld [vmem:[%s697_s2 + $0x8] sm:$0xff]  ;;  %v363_v11 = vld [vmem:[%s698_s3 + $0x18] sm:$0xff]  ;;  %s516_s21 = sshll.u32 %s705_s15, 4  ;;  %vm404_vm1 = vcmask 125952  }
   0xe   : > { %564 = vset.pattern.permute.xlu0 %v596_v3  ;;  %348 = vperm.xlu1 %565, %v334_v1   ;;  %s220_s28 = scalar_lea.vmem %s695_s0, %s515_s25  ;;  %v361_v8 = vld [vmem:[%s698_s3 + $0x8] sm:$0xff]  ;;  %v360_v10 = vld [vmem:[%s698_s3] sm:$0xff]  ;;  %v362_v13 = vld [vmem:[%s698_s3 + $0x10] sm:$0xff]  ;;  %s228_s24 = scalar_lea.vmem %s699_s4, %s516_s21 }
   0xf   : > { %338 = vperm.xlu0 %564, %v332_v2   ;;  %v566_v6 = vld [vmem:[%s220_s28 + $0x18] sm:$0xff]   ;;  %v567_v7 = vld [vmem:[%s220_s28 + $0x10] sm:$0xff]   ;;  %v568_v9 = vld [vmem:[%s220_s28 + $0x8] sm:$0xff]  }
  0x10   : > { %527 = vmatprep.subr.bf16.mxu0 %v566_v6  ;;  %v569_v12 = vld [vmem:[%s220_s28] sm:$0xff]   ;;  %v571_v14 = vld [vmem:[%s696_s1 + $0x8] sm:$0xff]  }
  0x11   : > { %528 = vmatpush3.bf16.msra.mxu0 %v566_v6 }
  0x12   : > { %353 = vperm.xlu1 %565, %v335_v4   ;;  %529 = vmatprep.subr.bf16.mxu0 %v567_v7 }
  0x13   : > { %343 = vperm.xlu0 %564, %v333_v5  }
  0x15   : > { %530 = vmatpush3.bf16.msra.mxu0 %v567_v7 }
  0x16   : > { %371 = vperm.xlu1 %565, %v361_v8   ;;  %531 = vmatprep.subr.bf16.mxu0 %v568_v9 }
  0x17   : > { %366 = vperm.xlu0 %564, %v360_v10  }
  0x19   : > { %532 = vmatpush3.bf16.msra.mxu0 %v568_v9 }
  0x1a   : > { %381 = vperm.xlu1 %565, %v363_v11   ;;  %533 = vmatprep.subr.bf16.mxu0 %v569_v12 }
  0x1b   : > { %376 = vperm.xlu0 %564, %v362_v13  }
  0x1d   : > { %534 = vmatpush3.bf16.msra.mxu0 %v569_v12 }
  0x20   : > { %536 = vmatmul.mubr.msk.bf16.vlgmr.msra.gmra.mxu0 %vm276_vm0, %v571_v14 }
  0x89   : > { %v349_v16 = vpop.permute.xlu1 %348 }
  0x8a   : > { %v339_v15 = vpop.permute.xlu0 %338 }
  0x8d   : > { %v354_v18 = vpop.permute.xlu1 %353 }
  0x8e   : > { %v344_v17 = vpop.permute.xlu0 %343 }
  0x91   : > { %v372_v20 = vpop.permute.xlu1 %371 }
  0x92   : > { %v367_v19 = vpop.permute.xlu0 %366 }
  0x95   : > { %v382_v31 = vpop.permute.xlu1 %381 }
  0x96   : > { %v377_v23 = vpop.permute.xlu0 %376 }
  0xe0   : > { %v537_v21 = vpop.f32.mrf.mxu0 }
  0xe1   : > { %v358_v22 = vmul.f32 %v537_v21, %v349_v16 }
  0xe2   : > { %v317_v24 = vpop.f32.mrf.mxu0 }
  0xe3   : > { %v386_v25 = vadd.f32 %v377_v23, %v358_v22  ;;  %v356_v26 = vmul.f32 %v339_v15, %v317_v24 }
  0xe4   : > { %v538_v27 = vpop.f32.mrf.mxu0 }
  0xe5   : > { %v519_v28 = vpack.c.bf16 %v386_v25, %v386_v25  ;;  %v384_v29 = vadd.f32 %v367_v19, %v356_v26  ;;  %v359_v30 = vmul.f32 %v538_v27, %v354_v18 }
  0xe6   : > { %v320_v32 = vpop.f32.mrf.mxu0 }
  0xe7   : > { %407 = vst.msk [vmem:[%s228_s24 + $0x8] sm:$0xf] %vm404_vm1, %v519_v28  ;;  %v517_v33 = vpack.c.bf16 %v384_v29, %v384_v29  ;;  %v387_v34 = vadd.f32 %v382_v31, %v359_v30  ;;  %v357_v35 = vmul.f32 %v344_v17, %v320_v32 }
  0xe9   : > { %405 = vst.msk [vmem:[%s228_s24] sm:$0xf] %vm404_vm1, %v517_v33  ;;  %v520_v36 = vpack.c.bf16 %v387_v34, %v387_v34  ;;  %v385_v37 = vadd.f32 %v372_v20, %v357_v35 }
  0xeb   : > { %408 = vst.msk [vmem:[%s228_s24 + $0xc] sm:$0xf] %vm404_vm1, %v520_v36  ;;  %v518_v38 = vpack.c.bf16 %v385_v37, %v385_v37 }
  0xed   : > { %406 = vst.msk [vmem:[%s228_s24 + $0x4] sm:$0xf] %vm404_vm1, %v518_v38 }
  0xee PF: > { %s14_s17 = sadd.s32 1, %s594_s17   ;;  %s700_s15 = smov %s590_s16 }
  0xef   : > { %p11_p5 = scmp.ge.s32.totalorder %s14_s17, 4   ;;  %s701_s16 = smov %s703_s18 }
  0xf1   :  { %13 = sbr.rel (!%p11_p5) target bundleno = 2 (0x2), region = 66 }

</bundles_post_ra>
